<compile_context>
chip_gen: v5e
topology: v5e:2x2
jax: 0.10.0
libtpu: 0.0.40
codegen_flags: <defaults>
</compile_context>

<pallas_src>
import functools

import jax
import jax.numpy as jnp
from jax.experimental import pallas as pl
from jax.experimental.pallas import tpu as pltpu

_MIN_BLOCK_BYTES = 512 * 1024  # don't shrink blocks below ~512 KiB just to add steps


def _tpu_kind() -> str:
    try:
        return jax.devices()[0].device_kind.lower()
    except Exception:
        return ""


def _block_config():
    """Returns (target_block_bytes, vmem_limit_bytes or None) per TPU generation."""
    mib = 1024 * 1024
    kind = _tpu_kind()
    if "v7" in kind or "7x" in kind:
        return 6 * mib, 48 * mib
    if "v6" in kind:
        return 6 * mib, 64 * mib
    if "v5" in kind:
        return 3 * mib, 32 * mib
    return 2 * mib, None  # unknown / older generation: conservative defaults


def _clip_kernel(bounds_ref, x_ref, o_ref, *, hard_clip, compute_dtype):
    # NOTE: on a masked (partial) tail block the out-of-bounds lanes contain
    # arbitrary data; it may flow through sigmoid (possibly inf/nan) but is
    # masked on store by the cdiv grid, so no extra masking is needed here.
    lo = bounds_ref[0].astype(compute_dtype)
    hi = bounds_ref[1].astype(compute_dtype)
    x = x_ref[...].astype(compute_dtype)
    if hard_clip:
        y = jnp.minimum(jnp.maximum(x, lo), hi)
    else:
        # jax.nn.sigmoid lowers to lax.logistic -> EUP transcendental (free slot
        # in a memory-bound kernel).
        y = jax.nn.sigmoid(x) * (hi - lo) + lo
    o_ref[...] = y.astype(o_ref.dtype)


def _clip_jnp(x, min_val, max_val, hard_clip, compute_dtype):
    """Plain-jnp fallback for the tiny (<128 element) tail / tiny inputs."""
    if hard_clip:
        lo = jnp.asarray(min_val, dtype=x.dtype)
        hi = jnp.asarray(max_val, dtype=x.dtype)
        return jnp.clip(x, lo, hi)
    xf = x.astype(compute_dtype)
    lo = jnp.asarray(min_val, dtype=compute_dtype)
    hi = jnp.asarray(max_val, dtype=compute_dtype)
    return (jax.nn.sigmoid(xf) * (hi - lo) + lo).astype(x.dtype)


def _clip_pallas_2d(x2d, bounds, hard_clip, compute_dtype,
                    block_bytes=None, min_block_bytes=None):
    rows, lane = x2d.shape
    sub = 8
    dtype_bytes = jnp.dtype(x2d.dtype).itemsize

    cfg_block_bytes, vmem_limit = _block_config()
    if block_bytes is None:
        block_bytes = cfg_block_bytes
    if min_block_bytes is None:
        min_block_bytes = _MIN_BLOCK_BYTES

    max_tile_rows = max(sub, (block_bytes // (lane * dtype_bytes)) // sub * sub)
    min_tile_rows = max(sub, (min_block_bytes // (lane * dtype_bytes)) // sub * sub)

    # Step-count policy: for large inputs force >= 8 steps (>= 4 per v7x TC)
    # and an even count; never shrink blocks below ~min_block_bytes, so small
    # inputs stay at 1-2 steps where per-step overhead dominates.
    MIN_STEPS = 8
    max_useful_steps = max(1, rows // min_tile_rows)
    steps = min(max(MIN_STEPS, pl.cdiv(rows, max_tile_rows)), max_useful_steps)
    if steps > 1 and steps % 2:
        steps += 1

    if steps <= 1:
        tile_rows = rows  # single full-extent block ((8,128) rule waived)
    else:
        tile_rows = pl.cdiv(rows, steps)
        tile_rows = ((tile_rows + sub - 1) // sub) * sub
        tile_rows = max(sub, min(tile_rows, max_tile_rows))
    grid_steps = pl.cdiv(rows, tile_rows)  # cdiv: edge block masked, no tail drop

    kernel = functools.partial(_clip_kernel, hard_clip=hard_clip,
                               compute_dtype=compute_dtype)

    cp_kwargs = dict(dimension_semantics=("parallel",))
    if vmem_limit is not None:
        cp_kwargs["vmem_limit_bytes"] = vmem_limit
    compiler_params = pltpu.CompilerParams(**cp_kwargs)

    def build(pipeline_mode):
        if pipeline_mode is None:
            x_spec = pl.BlockSpec((tile_rows, lane), lambda i: (i, 0))
        else:
            x_spec = pl.BlockSpec((tile_rows, lane), lambda i: (i, 0),
                                  pipeline_mode=pipeline_mode)
        return pl.pallas_call(
            kernel,
            out_shape=jax.ShapeDtypeStruct((rows, lane), x2d.dtype),
            grid_spec=pltpu.PrefetchScalarGridSpec(
                num_scalar_prefetch=0,
                grid=(grid_steps,),
                in_specs=[
                    pl.BlockSpec(memory_space=pltpu.MemorySpace.SMEM),  # bounds
                    x_spec,
                ],
                out_specs=pl.BlockSpec((tile_rows, lane), lambda i: (i, 0)),
            ),
            compiler_params=compiler_params,
        )

    if grid_steps >= 3:
        # Input-DMA-bound pipeline: a 3rd in-flight input buffer smooths
        # back-to-back DMA issue latency (budgeted into block_bytes above).
        try:
            return build(pl.Buffered(3))(bounds, x2d)
        except Exception:
            pass  # older jax / unsupported pipeline_mode: default 2-deep buffering
    return build(None)(bounds, x2d)


def clip_pallas(x, min_val, max_val, hard_clip=False, *,
                block_bytes=None, min_block_bytes=None):
    """Elementwise Clip (corenet Clip.forward). x: any-shape array (e.g. NCHW)."""
    hard_clip = bool(hard_clip)  # static: selects kernel branch at trace time
    orig_shape = x.shape
    orig_dtype = x.dtype
    n = x.size
    if n == 0:
        return x

    kind = _tpu_kind()
    bf16_fast = ("v6" in kind) or ("v7" in kind) or ("7x" in kind)
    if hard_clip:
        compute_dtype = orig_dtype            # clamp in native dtype
    elif orig_dtype == jnp.bfloat16 and bf16_fast:
        compute_dtype = jnp.bfloat16          # bf16 EUP sigmoid on v6e/v7x
    else:
        compute_dtype = jnp.float32

    lane = 128
    x_flat = jnp.reshape(x, (-1,))
    rem = n % lane
    n_main = n - rem

    if n_main == 0:
        # Fewer than one lane row: a kernel launch is pure overhead.
        y = _clip_jnp(x_flat, min_val, max_val, hard_clip, compute_dtype)
        return jnp.reshape(y, orig_shape)

    # Bounds live in SMEM: no recompile per (min, max) pair, traced values OK.
    bounds = jnp.asarray([min_val, max_val], dtype=jnp.float32)

    if rem == 0:
        main = x_flat  # common NCHW case: reshape only, zero extra HBM passes
    else:
        # 128-aligned prefix goes through the kernel; the <=127-element tail is
        # handled below with plain jnp (no full-array pad / output slice passes).
        main = jax.lax.slice(x_flat, (0,), (n_main,))
    x2d = jnp.reshape(main, (n_main // lane, lane))

    out2d = _clip_pallas_2d(x2d, bounds, hard_clip, compute_dtype,
                            block_bytes=block_bytes, min_block_bytes=min_block_bytes)
    out_main = jnp.reshape(out2d, (-1,))

    if rem == 0:
        return jnp.reshape(out_main, orig_shape)

    tail = jax.lax.slice(x_flat, (n_main,), (n,))
    tail_out = _clip_jnp(tail, min_val, max_val, hard_clip, compute_dtype)
    # TODO(synk): under jit, stitch via a donated lax.dynamic_update_slice to
    # also remove this concatenate copy on the odd-size path.
    out_flat = jnp.concatenate([out_main, tail_out.astype(orig_dtype)])
    return jnp.reshape(out_flat, orig_shape)


if __name__ == "__main__":
    key = jax.random.PRNGKey(0)
    k1, k2, k3 = jax.random.split(key, 3)
    min_val, max_val = 0.0, 1.0

    # 1) NCHW input whose numel divides 128 -> zero-copy fast path, single block.
    x = jax.random.normal(k1, (2, 4, 16, 16), dtype=jnp.float32) * 3.0
    y_soft = jax.block_until_ready(clip_pallas(x, min_val, max_val, hard_clip=False))
    ref_soft = jax.nn.sigmoid(x) * (max_val - min_val) + min_val
    assert jnp.allclose(y_soft, ref_soft, atol=1e-5, rtol=1e-5)

    y_hard = jax.block_until_ready(clip_pallas(x, min_val, max_val, hard_clip=True))
    ref_hard = jnp.clip(x, min_val, max_val)
    assert jnp.allclose(y_hard, ref_hard, atol=1e-6, rtol=1e-6)

    # 2) Odd-sized input -> aligned-prefix kernel + jnp tail (no pad/slice passes).
    x_odd = jax.random.normal(k2, (1, 3, 33, 33), dtype=jnp.float32) * 3.0
    y_soft2 = jax.block_until_ready(clip_pallas(x_odd, min_val, max_val, hard_clip=False))
    ref_soft2 = jax.nn.sigmoid(x_odd) * (max_val - min_val) + min_val
    assert jnp.allclose(y_soft2, ref_soft2, atol=1e-5, rtol=1e-5)

    y_hard2 = jax.block_until_ready(clip_pallas(x_odd, min_val, max_val, hard_clip=True))
    ref_hard2 = jnp.clip(x_odd, min_val, max_val)
    assert jnp.allclose(y_hard2, ref_hard2, atol=1e-6, rtol=1e-6)

    # 3) Small input with tiny block override: exercises the multi-step
    #    even-grid path + Buffered(3) input pipelining on a small test shape.
    x_ms = jax.random.normal(k3, (2, 8, 32, 32), dtype=jnp.float32) * 3.0
    y_ms = jax.block_until_ready(
        clip_pallas(x_ms, min_val, max_val, hard_clip=False,
                    block_bytes=64 * 1024, min_block_bytes=4 * 1024))
    ref_ms = jax.nn.sigmoid(x_ms) * (max_val - min_val) + min_val
    assert jnp.allclose(y_ms, ref_ms, atol=1e-5, rtol=1e-5)

    # 4) bf16 soft clip (native-dtype sigmoid on v6e/v7x, f32 upcast elsewhere).
    x_bf = (jax.random.normal(k3, (2, 8, 32, 32), dtype=jnp.float32) * 3.0).astype(jnp.bfloat16)
    y_bf = jax.block_until_ready(clip_pallas(x_bf, min_val, max_val, hard_clip=False))
    ref_bf = jax.nn.sigmoid(x_bf.astype(jnp.float32)) * (max_val - min_val) + min_val
    assert jnp.allclose(y_bf.astype(jnp.float32), ref_bf, atol=2e-2, rtol=2e-2)

    print("KERNEL_OK")
</pallas_src>

<mosaic_0001>
module attributes {stable_mosaic.version = 11 : i64} {
  func.func @_clip_kernel(%arg0: i32, %arg1: memref<2xf32, #tpu.memory_space<smem>>, %arg2: memref<16x128xf32, #tpu.memory_space<vmem>>, %arg3: memref<16x128xf32, #tpu.memory_space<vmem>>) attributes {dimension_semantics = [#tpu.dimension_semantics<parallel>], iteration_bounds = array<i64: 1>, scalar_prefetch = 0 : i64, scratch_operands = 0 : i64, tpu.core_type = #tpu.core_type<tc>, window_params = [{transform_indices = @transform_0, window_bounds = array<i64: 2>}, {transform_indices = @transform_1, window_bounds = array<i64: 16, 128>}, {transform_indices = @transform_2, window_bounds = array<i64: 16, 128>}]} {
    %c0 = arith.constant 0 : index
    %0 = memref.load %arg1[%c0] : memref<2xf32, #tpu.memory_space<smem>>
    %c1 = arith.constant 1 : index
    %1 = memref.load %arg1[%c1] : memref<2xf32, #tpu.memory_space<smem>>
    %c0_0 = arith.constant 0 : index
    %c0_1 = arith.constant 0 : index
    %2 = vector.load %arg2[%c0_0, %c0_1] : memref<16x128xf32, #tpu.memory_space<vmem>>, vector<16x128xf32>
    %3 = arith.negf %2 : vector<16x128xf32>
    %4 = math.exp %3 : vector<16x128xf32>
    %cst = arith.constant 1.000000e+00 : f32
    %5 = vector.broadcast %cst : f32 to vector<16x128xf32>
    %6 = arith.addf %5, %4 : vector<16x128xf32>
    %7 = arith.divf %5, %6 : vector<16x128xf32>
    %8 = arith.subf %1, %0 : f32
    %9 = vector.broadcast %8 : f32 to vector<16x128xf32>
    %10 = arith.mulf %7, %9 : vector<16x128xf32>
    %11 = vector.broadcast %0 : f32 to vector<16x128xf32>
    %12 = arith.addf %10, %11 : vector<16x128xf32>
    %c0_2 = arith.constant 0 : index
    %c0_3 = arith.constant 0 : index
    %13 = vector.load %arg3[%c0_2, %c0_3] : memref<16x128xf32, #tpu.memory_space<vmem>>, vector<16x128xf32>
    tpu.vector_store %arg3[%c0_2, %c0_3], %12 {strides = array<i32>} : memref<16x128xf32, #tpu.memory_space<vmem>>, vector<16x128xf32>,
    return
  }
  func.func @transform_0(%arg0: i32) -> i32 {
    %c0_i32 = arith.constant 0 : i32
    %c0_i32_0 = arith.constant 0 : i32
    return %c0_i32 : i32
  }
  func.func @transform_1(%arg0: i32) -> (i32, i32) {
    %c0_i32 = arith.constant 0 : i32
    %c0_i32_0 = arith.constant 0 : i32
    return %arg0, %c0_i32 : i32, i32
  }
  func.func @transform_2(%arg0: i32) -> (i32, i32) {
    %c0_i32 = arith.constant 0 : i32
    %c0_i32_0 = arith.constant 0 : i32
    return %arg0, %c0_i32 : i32, i32
  }
}

</mosaic_0001>

<bundles_post_ra>
// kernel: tpu_custom_call.1
= control target key start
LH: loop header
LB: loop body
LE: loop exit
PB: predicated region body
PF: predicated region fallthrough
CT: control target
= control target key end

     0   :  { %7 = vsyncpa [#allocation5], 0  ;;  %s233_s0 = inlined_call_operand.hbm [shape: f32[2], index: 0, kind: input, shape index: {}]   ;;  %s234_s1 = inlined_call_operand.hbm [shape: f32[16,128], index: 1, kind: input, shape index: {}]   ;;  %s235_s2 = inlined_call_operand.hbm [shape: f32[16,128], index: 2, kind: output, shape index: {}]  }
   0x1   :  { %8 = vsyncpa [#allocation3], 0 }
   0x2   :  { %9 = vsyncpa [#allocation4], 0  ;;  %s15_s11 = sshll.u32 %s233_s0, 4  ;;  %s23_s14 = sshll.u32 %s234_s1, 4  ;;  %s16_s11 = int_to_ptr.hbm [resolvable:$true] %s15_s11  ;;  %s24_s14 = int_to_ptr.hbm [resolvable:$true] %s23_s14 }
   0x3   :  { %s194_s15 = smov [#allocation2]   ;;  %s195_s16 = smov [#allocation6]  }
   0x4   :  { %18 = dma.hbm_to_smem %s16_s11, 16, %s194_s15, [#allocation5]  }
   0x5   :  { %s25_s17 = sshll.u32 %s195_s16, 4  ;;  %s196_s18 = smov 128   ;;  %s26_s17 = int_to_ptr.vmem [resolvable:$true] %s25_s17 }
   0x6   :  { %s197_s19 = smov 8  }
   0x7   :  { %31 = dma.hbm_to_vmem [thread:$0]  %s24_s14, 256, %s26_s17, [#allocation3], %s196_s18, %s196_s18, %s197_s19  }
   0x8   :  { %188 = dma.done.wait [#allocation5], 16  }
   0x9   :  { %189 = vsyncadd [#allocation5], 4294967280 }
   0xa   :  { %190 = dma.done.wait [#allocation3], 256  }
   0xb   :  { %191 = vsyncadd [#allocation3], 4294967040 }
   0xc   :  { %40 = sfence }
   0xd   :  { %v43_v0 = vld [vmem:[#allocation6] sm:$0xff]  ;;  %v44_v1 = vld [vmem:[#allocation6 + $0x8] sm:$0xff]  ;;  %s223_s0 = sld [smem:[#allocation2]]  ;;  %s198_s21 = smov [#allocation7]  }
   0xe   :  { %v113_v2 = vmul.f32 -1.442695, %v43_v0  ;;  %v114_v3 = vmul.f32 -1.442695, %v44_v1  ;;  %s112_s1 = sld [smem:[#allocation2 + $0x1]]  ;;  %s96_s22 = sshll.u32 %s198_s21, 4  ;;  %s97_s22 = int_to_ptr.vmem [resolvable:$true] %s96_s22 }
   0xf   :  { %s98_s25 = sshll.u32 %s235_s2, 4  ;;  %s99_s25 = int_to_ptr.hbm [resolvable:$true] %s98_s25 }
  0x10   :  { %120 = vpow2.f32 %v113_v2 }
  0x11   :  { %122 = vpow2.f32 %v114_v3 }
  0x13   :  { %v87_v27 = vstv %s223_s0 }
  0x14   :  { %s83_s20 = ssub.f32 %s112_s1, %s223_s0 }
  0x16   :  { %v121_v4 = vpop.eup %120  ;;  %v84_v23 = vstv %s83_s20 }
  0x17   :  { %v123_v5 = vpop.eup %122  ;;  %v51_v6 = vadd.f32 1.0, %v121_v4 }
  0x18   :  { %v52_v7 = vadd.f32 1.0, %v123_v5 }
  0x19   :  { %124 = vrcp.f32 %v51_v6  ;;  %vm58_vm0 = vweird.f32 %v51_v6  ;;  %v64_v11 = vand.u32 2147483648, %v51_v6  ;;  %v62_v14 = vand.u32 2147483647, %v51_v6 }
  0x1a   :  { %126 = vrcp.f32 %v52_v7  ;;  %v79_v15 = vand.u32 2147483648, %v52_v7  ;;  %vm73_vm2 = vweird.f32 %v52_v7  ;;  %v77_v17 = vand.u32 2147483647, %v52_v7 }
  0x1b   :  { %v65_v19 = vor.u32 1.1754944e-38, %v64_v11  ;;  %vm63_vm5 = vcmp.eq.f32.partialorder %v62_v14, 8.507059e+37 }
  0x1c   :  { %v80_v22 = vor.u32 1.1754944e-38, %v79_v15  ;;  %vm78_vm7 = vcmp.eq.f32.partialorder %v77_v17, 8.507059e+37 }
  0x1f   :  { %v125_v8 = vpop.eup %124 }
  0x20   :  { %v127_v9 = vpop.eup %126  ;;  %v54_v10 = vmul.f32 %v125_v8, %v51_v6  ;;  %vm59_vm1 = vweird.f32 %v125_v8 }
  0x21   :  { %v69_v12 = vmul.f32 %v127_v9, %v52_v7  ;;  %vm74_vm3 = vweird.f32 %v127_v9  ;;  %vm60_vm4 = vmor %vm58_vm0, %vm59_vm1 }
  0x22   :  { %v55_v13 = vsub.f32 1.0, %v54_v10  ;;  %vm75_vm6 = vmor %vm73_vm2, %vm74_vm3 }
  0x23   :  { %v70_v16 = vsub.f32 1.0, %v69_v12 }
  0x24   :  { %v56_v18 = vmul.f32 %v125_v8, %v55_v13 }
  0x25   :  { %v71_v20 = vmul.f32 %v127_v9, %v70_v16 }
  0x26   :  { %v57_v21 = vadd.f32 %v125_v8, %v56_v18 }
  0x27   :  { %v72_v24 = vadd.f32 %v127_v9, %v71_v20 }
  0x28   :  { %v61_v25 = vsel %vm60_vm4, %v125_v8, %v57_v21 }
  0x29   :  { %v66_v26 = vsel %vm63_vm5, %v65_v19, %v61_v25  ;;  %v76_v28 = vsel %vm75_vm6, %v127_v9, %v72_v24 }
  0x2a   :  { %v85_v29 = vmul.f32 %v84_v23, %v66_v26  ;;  %v81_v30 = vsel %vm78_vm7, %v80_v22, %v76_v28 }
  0x2b   :  { %v86_v31 = vmul.f32 %v84_v23, %v81_v30 }
  0x2c   :  { %v88_v32 = vadd.f32 %v87_v27, %v85_v29 }
  0x2d   :  { %v89_v33 = vadd.f32 %v87_v27, %v86_v31 }
  0x2e   :  { %90 = vst [vmem:[#allocation7] sm:$0xff] %v88_v32 }
  0x2f   :  { %91 = vst [vmem:[#allocation7 + $0x8] sm:$0xff] %v89_v33 }
  0x30   :  { %104 = dma.vmem_to_hbm [thread:$0]  %s97_s22, 256, %s99_s25, [#allocation4], %s196_s18, %s196_s18, %s197_s19  }
  0x31   :  { %192 = dma.done.wait [#allocation4], 256  }
  0x32   :  { %193 = vsyncadd [#allocation4], 4294967040 }
  0x33   :  { %109 = vsyncpa [#allocation3], 1 }
  0x34   :  { %110 = vsyncpa [#allocation4], 1 }
  0x35   :  { %111 = vsyncpa [#allocation5], 1 }

</bundles_post_ra>
